<compile_context>
chip_gen: v7x
topology: tpu7x:2x2x1
jax: 0.10.0
libtpu: 0.0.40
codegen_flags: <defaults>
</compile_context>

<pallas_src>
import functools

import jax
import jax.numpy as jnp
from jax import lax
from jax.experimental import pallas as pl
from jax.experimental.pallas import tpu as pltpu


def _round_up(x: int, m: int) -> int:
    return ((x + m - 1) // m) * m


def _mnrl_kernel(a_ref, bt_ref, diag_ref, out_ref, m_sc, l_sc, *,
                 n_valid_cols: int, block_n: int, mask_cols: bool):
    j = pl.program_id(1)   # column block (reduction axis)

    # MXU matmul: (TM, d) @ (d, TN), standard contraction (no in-kernel transpose),
    # f32 accumulation. `a` already carries the L2 normalization and the scale factor.
    scores = jnp.dot(a_ref[...], bt_ref[...], preferred_element_type=jnp.float32)

    if mask_cols:  # static: only emitted when the column dimension was padded.
        # (1, TN) iota + scalar compare, broadcast in the select. Only the last column
        # block actually contains invalid columns; padding < block_n guarantees every
        # block keeps >= 1 valid column, so -1e30 can never dominate a whole block.
        col = lax.broadcasted_iota(jnp.int32, (1, scores.shape[1]), 1)
        scores = jnp.where(col < (n_valid_cols - j * block_n), scores, jnp.float32(-1e30))

    @pl.when(j == 0)
    def _init():
        m_sc[...] = jnp.full_like(m_sc, -1e30)
        l_sc[...] = jnp.zeros_like(l_sc)

    # Online logsumexp over column blocks; all stats stay (TM, 1).
    m_prev = m_sc[...]
    m_new = jnp.maximum(m_prev, jnp.max(scores, axis=-1, keepdims=True))
    alpha = jnp.exp(m_prev - m_new)
    l_sc[...] = alpha * l_sc[...] + jnp.sum(jnp.exp(scores - m_new), axis=-1, keepdims=True)
    m_sc[...] = m_new

    @pl.when(j == pl.num_programs(1) - 1)
    def _finalize():
        # per-row NLL = logsumexp(row) - positive-pair logit
        out_ref[...] = m_sc[...] + jnp.log(l_sc[...]) - diag_ref[...]


def multiple_negatives_ranking_loss(left: jax.Array, right: jax.Array,
                                    scale: float = 20.0,
                                    block_m: int | None = None,
                                    block_n: int | None = None,
                                    use_bf16_matmul: bool = False):
    """left, right: (N, d) embedding batches. Returns scalar f32 loss."""
    assert left.ndim == 2 and left.shape == right.shape
    N, d = left.shape

    # ---- one-time O(N*d) prep in XLA (hoisted out of the O(N^2*d) kernel loop) ----
    eps_sq = jnp.float32(1e-24)
    a = left.astype(jnp.float32)
    b = right.astype(jnp.float32)
    # torch.nn.functional.normalize(p=2, dim=1): v / max(||v||, 1e-12)
    a_n = a * lax.rsqrt(jnp.maximum(jnp.sum(a * a, axis=-1, keepdims=True), eps_sq))
    b_n = b * lax.rsqrt(jnp.maximum(jnp.sum(b * b, axis=-1, keepdims=True), eps_sq))

    mxu_dtype = (jnp.bfloat16
                 if (left.dtype == jnp.bfloat16 or right.dtype == jnp.bfloat16
                     or use_bf16_matmul)
                 else jnp.float32)

    # Fold the scale into the anchor side once; cast both operands to the MXU feed dtype.
    a_feed = (a_n * jnp.float32(scale)).astype(mxu_dtype)
    b_feed = b_n.astype(mxu_dtype)
    # Positive-pair (diagonal) logits from exactly the same precision path as the MXU feed,
    # so the numerator and the logsumexp denominator stay consistent.
    diag = jnp.sum(a_feed.astype(jnp.float32) * b_feed.astype(jnp.float32),
                   axis=-1, keepdims=True)                       # (N, 1) f32
    b_t = b_feed.T                                               # (d, N): lane dim = columns

    # ---- block sizes (asymmetric: TM independent of TN) ----
    if block_m is None:
        block_m = 512 if N > 512 else _round_up(N, 8)
    block_m = max(8, _round_up(min(block_m, _round_up(N, 8)), 8))

    if block_n is None:
        block_n = 256
    if block_n >= N:
        block_n = N                          # single column block: no padding, no mask
    else:
        block_n = _round_up(block_n, 128)    # multi-block: lane-aligned column tiles
        if block_n >= N:
            block_n = N

    n_rows = _round_up(N, block_m)
    n_cols = _round_up(N, block_n)
    grid_m = n_rows // block_m
    grid_n = n_cols // block_n
    mask_cols = (n_cols != N)

    if n_rows != N:
        a_feed = jnp.pad(a_feed, ((0, n_rows - N), (0, 0)))
        diag = jnp.pad(diag, ((0, n_rows - N), (0, 0)))
    if n_cols != N:
        b_t = jnp.pad(b_t, ((0, 0), (0, n_cols - N)))

    elem = jnp.dtype(mxu_dtype).itemsize
    cost = pl.CostEstimate(
        flops=2 * n_rows * n_cols * d,
        transcendentals=n_rows * n_cols,
        bytes_accessed=(grid_m * n_cols * d * elem    # right re-streamed per row block
                        + n_rows * d * elem           # left streamed once
                        + n_rows * 4 * 2),            # diag in + per-row NLL out
    )

    # Explicit VMEM budget only when tiles get big (double-buffered inputs + stats);
    # capped at 64 MiB so it is valid on v7x as well as v5e/v6e.
    vmem_need = 2 * (block_m * d + d * block_n) * elem + 8 * block_m * 4
    vmem_limit = None
    if vmem_need > 24 * 1024 * 1024:
        vmem_limit = int(min(max(vmem_need * 3 // 2, 32 * 1024 * 1024), 64 * 1024 * 1024))

    kernel = functools.partial(
        _mnrl_kernel, n_valid_cols=N, block_n=block_n, mask_cols=mask_cols)

    per_row = pl.pallas_call(
        kernel,
        out_shape=jax.ShapeDtypeStruct((n_rows, 1), jnp.float32),
        grid_spec=pltpu.PrefetchScalarGridSpec(
            num_scalar_prefetch=0,
            grid=(grid_m, grid_n),
            in_specs=[
                pl.BlockSpec((block_m, d), lambda i, j: (i, 0)),   # scaled+normalized anchors
                pl.BlockSpec((d, block_n), lambda i, j: (0, j)),   # normalized positives^T
                pl.BlockSpec((block_m, 1), lambda i, j: (i, 0)),   # positive-pair logits
            ],
            out_specs=pl.BlockSpec((block_m, 1), lambda i, j: (i, 0)),
            scratch_shapes=[
                pltpu.VMEM((block_m, 1), jnp.float32),   # running max  m
                pltpu.VMEM((block_m, 1), jnp.float32),   # running sum  l
            ],
        ),
        compiler_params=pltpu.CompilerParams(
            dimension_semantics=("parallel", "arbitrary"),
            vmem_limit_bytes=vmem_limit),
        cost_estimate=cost,
    )(a_feed, b_t, diag)

    # CrossEntropyLoss mean reduction: drop padded rows, average over the real batch.
    return jnp.mean(per_row[:N, 0])


def _reference_loss(left, right, scale=20.0):
    # Pure-JAX reference for sanity checking.
    a = left / jnp.maximum(jnp.linalg.norm(left, axis=1, keepdims=True), 1e-12)
    b = right / jnp.maximum(jnp.linalg.norm(right, axis=1, keepdims=True), 1e-12)
    scores = (a @ b.T) * scale
    logz = jax.scipy.special.logsumexp(scores, axis=-1)
    diag = jnp.diagonal(scores)
    return jnp.mean(logz - diag)


if __name__ == "__main__":
    key = jax.random.PRNGKey(0)
    k1, k2, k3, k4, k5, k6 = jax.random.split(key, 6)

    # Test 1: single block, N=8 sentence pairs, embedding dim d=32.
    N, d = 8, 32
    left = jax.random.normal(k1, (N, d), dtype=jnp.float32)
    right = jax.random.normal(k2, (N, d), dtype=jnp.float32)
    loss = multiple_negatives_ranking_loss(left, right, scale=20.0)
    jax.block_until_ready(loss)
    ref = _reference_loss(left, right, scale=20.0)
    assert jnp.allclose(loss, ref, atol=1e-4, rtol=1e-4), (loss, ref)

    # Test 2: multiple row blocks, single column block (N not a multiple of block_m).
    N2, d2 = 12, 32
    left2 = jax.random.normal(k3, (N2, d2), dtype=jnp.float32)
    right2 = jax.random.normal(k4, (N2, d2), dtype=jnp.float32)
    loss2 = multiple_negatives_ranking_loss(left2, right2, scale=20.0, block_m=8)
    jax.block_until_ready(loss2)
    ref2 = _reference_loss(left2, right2, scale=20.0)
    assert jnp.allclose(loss2, ref2, atol=1e-4, rtol=1e-4), (loss2, ref2)

    # Test 3: 3x3 tiled grid with column masking + online logsumexp across column blocks.
    N3, d3 = 300, 128
    left3 = jax.random.normal(k5, (N3, d3), dtype=jnp.float32)
    right3 = jax.random.normal(k6, (N3, d3), dtype=jnp.float32)
    loss3 = multiple_negatives_ranking_loss(left3, right3, scale=20.0,
                                            block_m=128, block_n=128)
    jax.block_until_ready(loss3)
    ref3 = _reference_loss(left3, right3, scale=20.0)
    assert jnp.allclose(loss3, ref3, atol=1e-4, rtol=1e-4), (loss3, ref3)

    # Test 4: bf16 MXU feed flag (f32 accumulation / f32 softmax math), looser tolerance.
    loss4 = multiple_negatives_ranking_loss(left3, right3, scale=20.0,
                                            block_m=128, block_n=128,
                                            use_bf16_matmul=True)
    jax.block_until_ready(loss4)
    assert jnp.allclose(loss4, ref3, atol=1e-1, rtol=5e-2), (loss4, ref3)

    print("KERNEL_OK")
</pallas_src>

<mosaic_0001>
module attributes {stable_mosaic.version = 11 : i64} {
  func.func @_mnrl_kernel(%arg0: i32, %arg1: i32, %arg2: memref<8x32xf32, #tpu.memory_space<vmem>>, %arg3: memref<32x8xf32, #tpu.memory_space<vmem>>, %arg4: memref<8x1xf32, #tpu.memory_space<vmem>>, %arg5: memref<8x1xf32, #tpu.memory_space<vmem>>, %arg6: memref<8x1xf32, #tpu.memory_space<vmem>>, %arg7: memref<8x1xf32, #tpu.memory_space<vmem>>) attributes {dimension_semantics = [#tpu.dimension_semantics<parallel>, #tpu.dimension_semantics<arbitrary>], iteration_bounds = array<i64: 1, 1>, scalar_prefetch = 0 : i64, scratch_operands = 2 : i64, tpu.core_type = #tpu.core_type<tc>, window_params = [{transform_indices = @transform_0, window_bounds = array<i64: 8, 32>}, {transform_indices = @transform_1, window_bounds = array<i64: 32, 8>}, {transform_indices = @transform_2, window_bounds = array<i64: 8, 1>}, {transform_indices = @transform_3, window_bounds = array<i64: 8, 1>}]} {
    %c0 = arith.constant 0 : index
    %c0_0 = arith.constant 0 : index
    %0 = vector.load %arg2[%c0, %c0_0] : memref<8x32xf32, #tpu.memory_space<vmem>>, vector<8x32xf32>
    %c0_1 = arith.constant 0 : index
    %c0_2 = arith.constant 0 : index
    %1 = vector.load %arg3[%c0_1, %c0_2] : memref<32x8xf32, #tpu.memory_space<vmem>>, vector<32x8xf32>
    %cst = arith.constant dense<0.000000e+00> : vector<8x8xf32>
    %2 = tpu.matmul %0, %1, %cst {dimension_numbers = #tpu.dot_dimension_numbers<[1], [0], [0], [1], [0, 0, 1, 1], [], []>} : vector<8x32xf32>, vector<32x8xf32>, vector<8x8xf32> -> vector<8x8xf32>
    %c0_i32 = arith.constant 0 : i32
    %3 = arith.cmpi eq, %arg1, %c0_i32 : i32
    %4 = arith.extui %3 : i1 to i32
    %c0_i32_3 = arith.constant 0 : i32
    %5 = arith.cmpi ne, %4, %c0_i32_3 : i32
    scf.if %5 {
      %cst_16 = arith.constant -1.000000e+30 : f32
      %25 = vector.broadcast %cst_16 : f32 to vector<8x1xf32>
      %c0_17 = arith.constant 0 : index
      %c0_18 = arith.constant 0 : index
      %26 = vector.load %arg6[%c0_17, %c0_18] : memref<8x1xf32, #tpu.memory_space<vmem>>, vector<8x1xf32>
      tpu.vector_store %arg6[%c0_17, %c0_18], %25 {strides = array<i32>} : memref<8x1xf32, #tpu.memory_space<vmem>>, vector<8x1xf32>,
      %cst_19 = arith.constant 0.000000e+00 : f32
      %27 = vector.broadcast %cst_19 : f32 to vector<8x1xf32>
      %c0_20 = arith.constant 0 : index
      %c0_21 = arith.constant 0 : index
      %28 = vector.load %arg7[%c0_20, %c0_21] : memref<8x1xf32, #tpu.memory_space<vmem>>, vector<8x1xf32>
      tpu.vector_store %arg7[%c0_20, %c0_21], %27 {strides = array<i32>} : memref<8x1xf32, #tpu.memory_space<vmem>>, vector<8x1xf32>,
    } else {
    }
    %c0_4 = arith.constant 0 : index
    %c0_5 = arith.constant 0 : index
    %6 = vector.load %arg6[%c0_4, %c0_5] : memref<8x1xf32, #tpu.memory_space<vmem>>, vector<8x1xf32>
    %cst_6 = arith.constant dense<0xFF800000> : vector<8xf32>
    %7 = vector.multi_reduction <maximumf>, %2, %cst_6 [1] : vector<8x8xf32> to vector<8xf32>
    %8 = vector.shape_cast %7 : vector<8xf32> to vector<8x1xf32>
    %9 = arith.maximumf %6, %8 : vector<8x1xf32>
    %10 = arith.subf %6, %9 : vector<8x1xf32>
    %11 = math.exp %10 : vector<8x1xf32>
    %c0_7 = arith.constant 0 : index
    %c0_8 = arith.constant 0 : index
    %12 = vector.load %arg7[%c0_7, %c0_8] : memref<8x1xf32, #tpu.memory_space<vmem>>, vector<8x1xf32>
    %13 = arith.mulf %11, %12 : vector<8x1xf32>
    %14 = vector.broadcast %9 : vector<8x1xf32> to vector<8x8xf32>
    %15 = arith.subf %2, %14 : vector<8x8xf32>
    %16 = math.exp %15 : vector<8x8xf32>
    %cst_9 = arith.constant dense<0.000000e+00> : vector<8xf32>
    %17 = vector.multi_reduction <add>, %16, %cst_9 [1] : vector<8x8xf32> to vector<8xf32>
    %18 = vector.shape_cast %17 : vector<8xf32> to vector<8x1xf32>
    %19 = arith.addf %13, %18 : vector<8x1xf32>
    %c0_10 = arith.constant 0 : index
    %c0_11 = arith.constant 0 : index
    %20 = vector.load %arg7[%c0_10, %c0_11] : memref<8x1xf32, #tpu.memory_space<vmem>>, vector<8x1xf32>
    tpu.vector_store %arg7[%c0_10, %c0_11], %19 {strides = array<i32>} : memref<8x1xf32, #tpu.memory_space<vmem>>, vector<8x1xf32>,
    %c0_12 = arith.constant 0 : index
    %c0_13 = arith.constant 0 : index
    %21 = vector.load %arg6[%c0_12, %c0_13] : memref<8x1xf32, #tpu.memory_space<vmem>>, vector<8x1xf32>
    tpu.vector_store %arg6[%c0_12, %c0_13], %9 {strides = array<i32>} : memref<8x1xf32, #tpu.memory_space<vmem>>, vector<8x1xf32>,
    %c0_i32_14 = arith.constant 0 : i32
    %22 = arith.cmpi eq, %arg1, %c0_i32_14 : i32
    %23 = arith.extui %22 : i1 to i32
    %c0_i32_15 = arith.constant 0 : i32
    %24 = arith.cmpi ne, %23, %c0_i32_15 : i32
    scf.if %24 {
      %c0_16 = arith.constant 0 : index
      %c0_17 = arith.constant 0 : index
      %25 = vector.load %arg6[%c0_16, %c0_17] : memref<8x1xf32, #tpu.memory_space<vmem>>, vector<8x1xf32>
      %c0_18 = arith.constant 0 : index
      %c0_19 = arith.constant 0 : index
      %26 = vector.load %arg7[%c0_18, %c0_19] : memref<8x1xf32, #tpu.memory_space<vmem>>, vector<8x1xf32>
      %27 = math.log %26 : vector<8x1xf32>
      %28 = arith.addf %25, %27 : vector<8x1xf32>
      %c0_20 = arith.constant 0 : index
      %c0_21 = arith.constant 0 : index
      %29 = vector.load %arg4[%c0_20, %c0_21] : memref<8x1xf32, #tpu.memory_space<vmem>>, vector<8x1xf32>
      %30 = arith.subf %28, %29 : vector<8x1xf32>
      %c0_22 = arith.constant 0 : index
      %c0_23 = arith.constant 0 : index
      %31 = vector.load %arg5[%c0_22, %c0_23] : memref<8x1xf32, #tpu.memory_space<vmem>>, vector<8x1xf32>
      tpu.vector_store %arg5[%c0_22, %c0_23], %30 {strides = array<i32>} : memref<8x1xf32, #tpu.memory_space<vmem>>, vector<8x1xf32>,
    } else {
    }
    return
  }
  func.func @transform_0(%arg0: i32, %arg1: i32) -> (i32, i32) {
    %c0_i32 = arith.constant 0 : i32
    %c0_i32_0 = arith.constant 0 : i32
    return %arg0, %c0_i32 : i32, i32
  }
  func.func @transform_1(%arg0: i32, %arg1: i32) -> (i32, i32) {
    %c0_i32 = arith.constant 0 : i32
    %c0_i32_0 = arith.constant 0 : i32
    return %c0_i32, %arg1 : i32, i32
  }
  func.func @transform_2(%arg0: i32, %arg1: i32) -> (i32, i32) {
    %c0_i32 = arith.constant 0 : i32
    %c0_i32_0 = arith.constant 0 : i32
    return %arg0, %c0_i32 : i32, i32
  }
  func.func @transform_3(%arg0: i32, %arg1: i32) -> (i32, i32) {
    %c0_i32 = arith.constant 0 : i32
    %c0_i32_0 = arith.constant 0 : i32
    return %arg0, %c0_i32 : i32, i32
  }
}

</mosaic_0001>

<bundles_post_ra>
// kernel: tpu_custom_call.1
= control target key start
LH: loop header
LB: loop body
LE: loop exit
PB: predicated region body
PF: predicated region fallthrough
CT: control target
= control target key end

     0   :  { %vm97_vm0 = vcmask 7168   ;;  %v176_v0 = vmov 0.0|0.0   ;;  %vm177_vm1 = vmmov 0   ;;  %v178_v4 = vmov 0.0   ;;  %s229_s1 = inlined_call_operand.vmem [shape: f32[32,8], index: 1, kind: input, shape index: {}]   ;;  %s230_s0 = inlined_call_operand.vmem [shape: f32[8,32], index: 0, kind: input, shape index: {}]   ;;  %s231_s2 = inlined_call_operand.vmem [shape: f32[8,1], index: 2, kind: input, shape index: {}]   ;;  %s232_s3 = inlined_call_operand.vmem [shape: f32[8,1], index: 3, kind: output, shape index: {}]  }
   0x1   :  { %158 = vmatprep.subr.bf16.mxu0 %v176_v0  ;;  %v15_v1 = vld [vmem:[%s229_s1] sm:$0xff]  ;;  %v16_v2 = vld [vmem:[%s229_s1 + $0x8] sm:$0xff]  ;;  %v17_v3 = vld [vmem:[%s229_s1 + $0x10] sm:$0xff]  ;;  %155 = vmatprep.mubr.msk.f32.mxu0 %vm177_vm1, %v178_v4  ;;  %99 = vst.msk [vmem:[#allocation3] sm:$0xff] %vm97_vm0, %v178_v4  ;;  %vm19_vm2 = vcmask 261120   ;;  %vm101_vm3 = vcmask 64512  }
   0x2   :  { %v159_v5 = vpack.c.bf16 %v16_v2, %v15_v1  ;;  %v18_v6 = vld [vmem:[%s229_s1 + $0x18] sm:$0xff]  ;;  %v14_v8 = vld [vmem:[%s230_s0] sm:$0xff]  ;;  %v179_v9 = vmov -1e+30   ;;  %v180_v13 = vmov 0  }
   0x3   :  { %v162_v7 = vpack.c.bf16 %v18_v6, %v17_v3  ;;  %98 = vst.msk [vmem:[#allocation2] sm:$0xff] %vm97_vm0, %v179_v9  ;;  %169 = vset.pattern.permute.xlu0 %v180_v13  ;;  %v134_v33 = vld [vmem:[%s231_s2] sm:$0xff] }
   0x4   :  { %160 = vmatpush3.bf16.msra.mxu0 %v159_v5 }
   0x5   :  { %161 = vmatprep.subr.bf16.mxu0 %v176_v0 }
   0x8   :  { %163 = vmatpush3.bf16.msra.mxu0 %v162_v7  ;;  %v109_v25 = vld [vmem:[#allocation3] sm:$0xff] }
   0xa   :  { %v100_v14 = vld [vmem:[#allocation2] sm:$0xff] }
   0xb   :  { %156 = vmatmul.mubr.msk.f32.vlgmr.msra.gmra.mrb[0].mxu0 %vm19_vm2, %v14_v8 }
  0xde   :  { %v89_v10 = vpop.f32.mrb[0].mxu0 }
  0xdf   :  { %v157_v11 = vpop.f32.mrb[1].mxu0  ;;  %v102_v12 = vsel %vm101_vm3, %v89_v10, -inf }
  0xe0   :  { %103 = vmax.xlane.f32.xlu0 %v102_v12 }
 0x16d   :  { %v104_v15 = vpop.xlane.xlu0 %103 }
 0x16e   :  { %v105_v16 = vmax.f32 %v100_v14, %v104_v15 }
 0x170   :  { %v106_v17 = vsub.f32 %v100_v14, %v105_v16  ;;  %125 = vst.msk [vmem:[#allocation2] sm:$0xff] %vm97_vm0, %v105_v16  ;;  %113 = vperm.xlu0 %169, %v105_v16  }
 0x172   :  { %v107_v23 = vmul.f32 1.442695, %v106_v17 }
 0x177   :  { %v129_v32 = vld [vmem:[#allocation2] sm:$0xff] }
 0x1ef   :  { %v114_v18 = vpop.permute.xlu0 %113 }
 0x1f0   :  { %v116_v19 = vsub.f32 %v89_v10, %v114_v18 }
 0x1f2   :  { %v117_v20 = vmul.f32 1.442695, %v116_v19 }
 0x1f4   :  { %170 = vpow2.f32 %v117_v20 }
 0x1f5   :  { %172 = vpow2.f32 %v107_v23 }
 0x1fe   :  { %v171_v21 = vpop.eup %170 }
 0x1ff   :  { %v119_v22 = vsel %vm101_vm3, %v171_v21, 0.0  ;;  %v173_v24 = vpop.eup %172 }
 0x200   :  { %120 = vadd.xlane.f32.xlu1 %v119_v22  ;;  %v110_v26 = vmul.f32 %v173_v24, %v109_v25 }
 0x28d   :  { %v121_v27 = vpop.xlane.xlu1 %120 }
 0x28e   :  { %v122_v28 = vadd.f32 %v121_v27, %v110_v26 }
 0x290   :  { %124 = vst.msk [vmem:[#allocation3] sm:$0xff] %vm97_vm0, %v122_v28 }
 0x297   :  { %v130_v29 = vld [vmem:[#allocation3] sm:$0xff] }
 0x298   :  { %174 = vlog2.f32 %v130_v29 }
 0x2a2   :  { %v175_v30 = vpop.eup %174 }
 0x2a3   :  { %v132_v31 = vmul.f32 0.6931472, %v175_v30 }
 0x2a5   :  { %v133_v34 = vadd.f32 %v132_v31, %v129_v32 }
 0x2a7   :  { %v135_v35 = vsub.f32 %v133_v34, %v134_v33 }
 0x2a9   :  { %136 = vst.msk [vmem:[%s232_s3] sm:$0xff] %vm97_vm0, %v135_v35 }

</bundles_post_ra>
